<compile_context>
chip_gen: v5e
topology: v5e:2x2
jax: 0.10.0
libtpu: 0.0.40
codegen_flags: <defaults>
</compile_context>

<pallas_src>
import jax
import jax.numpy as jnp
from jax.experimental import pallas as pl
from jax.experimental.pallas import tpu as pltpu


def _feature_mask_kernel(x_ref, mask_ref, o_ref):
    # x_ref:    (TB, TF) tile of the input
    # mask_ref: (1,  TF) broadcast mask row for this feature tile
    # o_ref:    (TB, TF) output tile
    o_ref[...] = x_ref[...] * mask_ref[...]


def _tile_budget():
    """Per-generation x-tile byte budget and scoped-VMEM limit."""
    vmem_cap = None
    try:
        vmem_cap = getattr(pltpu.get_tpu_info(), "vmem_capacity_bytes", None)
    except Exception:
        vmem_cap = None
    if vmem_cap is not None and vmem_cap >= 96 * 1024 * 1024:
        # v5e / v6e: 128 MiB physical VMEM -> big tiles amortize the
        # ~0.35 us per-grid-step overhead to ~3-4%.
        return 8 * 1024 * 1024, 64 * 1024 * 1024
    # v7x (64 MiB per TC) or unknown: stay conservative so this kernel keeps
    # headroom even when fused into larger pipelines.
    return 4 * 1024 * 1024, 40 * 1024 * 1024


def feature_mask_forward(
    x: jax.Array,
    mask: jax.Array,
    *,
    target_lanes: int = 2048,
    donate_x: bool = False,
) -> jax.Array:
    """y = x * mask, with mask of shape (F,) broadcast over leading axes of x."""
    orig_shape = x.shape
    F = orig_shape[-1]
    assert mask.shape == (F,), f"mask must be ({F},), got {mask.shape}"

    mask = mask.astype(x.dtype)          # single-dtype VPU multiply
    x2 = x.reshape(-1, F)                # free (row-major contiguous) reshape
    B = x2.shape[0]

    itemsize = jnp.dtype(x.dtype).itemsize
    pack = {4: 8, 2: 16, 1: 32}.get(itemsize, 8)   # sublane pack factor
    tile_bytes, vmem_limit = _tile_budget()

    # ---- lane widening (layout only, zero copies): fold batch rows into the
    # lane axis when F is a narrow multiple of 128 and the fold divides B. ----
    fold = 1
    if F % 128 == 0 and F < target_lanes and B > 1:
        cand = min(B, max(1, target_lanes // F))
        while cand > 1 and B % cand != 0:
            cand -= 1
        fold = cand
    if fold > 1:
        x_w = x2.reshape(B // fold, fold * F)      # contiguous -> free
        mask_w = jnp.tile(mask, fold)              # tiny (fold*F,) array
    else:
        x_w, mask_w = x2, mask
    Bw, Fw = x_w.shape
    mask2d = mask_w.reshape(1, Fw)

    # ---- feature tile: full axis when it fits, else a lane-aligned chunk
    # small enough that >= `pack` rows still fit the byte budget. ----
    max_tile_f = max(512, ((tile_bytes // (pack * itemsize)) // 512) * 512)
    tile_f = Fw if Fw <= max_tile_f else max_tile_f
    grid_f = pl.cdiv(Fw, tile_f)

    # ---- batch tile: fill the byte budget, multiple of the pack factor. ----
    rows = max(pack, tile_bytes // max(1, tile_f * itemsize))
    if rows >= Bw:
        tile_b = Bw                                # full batch in one block
    else:
        tile_b = (rows // pack) * pack
    grid_b = pl.cdiv(Bw, tile_b)

    # ---- megacore: guarantee >= 2 parallel grid steps for mid/large arrays
    # (v7x has 2 TensorCores; costs one extra ~0.35us step on 1-TC chips). ----
    if grid_f * grid_b == 1 and Bw >= 2 * pack and Bw * Fw * itemsize >= 2 * 1024 * 1024:
        half = -(-Bw // 2)
        tile_b = min(Bw, -(-half // pack) * pack)
        grid_b = pl.cdiv(Bw, tile_b)

    # Feature axis OUTER, batch INNER: the mask block index stays constant
    # across the inner loop, so it is DMA'd once per feature tile.
    grid = (grid_f, grid_b)

    extra = {}
    if donate_x:
        extra["input_output_aliases"] = {0: 0}

    out = pl.pallas_call(
        _feature_mask_kernel,
        out_shape=jax.ShapeDtypeStruct((Bw, Fw), x.dtype),
        grid_spec=pltpu.PrefetchScalarGridSpec(
            num_scalar_prefetch=0,
            grid=grid,
            in_specs=[
                pl.BlockSpec((tile_b, tile_f), lambda j, i: (i, j)),   # x tile
                pl.BlockSpec((1, tile_f), lambda j, i: (0, j)),        # mask row
            ],
            out_specs=pl.BlockSpec((tile_b, tile_f), lambda j, i: (i, j)),
        ),
        compiler_params=pltpu.CompilerParams(
            dimension_semantics=("parallel", "parallel"),
            vmem_limit_bytes=vmem_limit,
        ),
        cost_estimate=pl.CostEstimate(
            flops=B * F,
            transcendentals=0,
            bytes_accessed=(2 * B * F + F) * itemsize,
        ),
        **extra,
    )(x_w, mask2d)

    # Undo the (free) layout reshapes; nothing to slice, nothing was padded.
    return out.reshape(orig_shape)


if __name__ == "__main__":
    key = jax.random.PRNGKey(0)
    kx, km = jax.random.split(key)

    # Primary check: FeatureMaskLayer(input_size=128) with its default init
    # (mask = ones), batch of 16.
    batch, input_size = 16, 128
    x = jax.random.normal(kx, (batch, input_size), dtype=jnp.float32)
    mask = jnp.ones((input_size,), dtype=jnp.float32)
    y = jax.block_until_ready(feature_mask_forward(x, mask))
    assert y.shape == x.shape
    assert jnp.array_equal(y, x * mask), "mismatch vs reference (ones mask, 16x128)"

    # Non-trivial mask (exercises the multiply on the lane-folded path).
    mask_r = jax.random.normal(km, (input_size,), dtype=jnp.float32)
    y_r = jax.block_until_ready(feature_mask_forward(x, mask_r))
    assert jnp.allclose(y_r, x * mask_r, rtol=0, atol=0), "mismatch (random mask, 16x128)"

    # Ragged, non-lane-aligned shape: no wrapper padding, handled by Pallas
    # boundary masking + full-dim blocks.
    x2 = jax.random.normal(jax.random.PRNGKey(1), (10, 96), dtype=jnp.float32)
    mask2 = jax.random.normal(jax.random.PRNGKey(2), (96,), dtype=jnp.float32)
    y2 = jax.block_until_ready(feature_mask_forward(x2, mask2))
    assert jnp.allclose(y2, x2 * mask2, rtol=0, atol=0), "mismatch (10x96)"

    # Higher-rank input (mask broadcasts over all leading axes, like the module).
    x3 = jax.random.normal(jax.random.PRNGKey(3), (2, 4, 32), dtype=jnp.float32)
    mask3 = jax.random.normal(jax.random.PRNGKey(4), (32,), dtype=jnp.float32)
    y3 = jax.block_until_ready(feature_mask_forward(x3, mask3))
    assert jnp.allclose(y3, x3 * mask3, rtol=0, atol=0), "mismatch (2x4x32)"

    print("KERNEL_OK")
</pallas_src>

<mosaic_0001>
module attributes {stable_mosaic.version = 11 : i64} {
  func.func @_feature_mask_kernel(%arg0: i32, %arg1: i32, %arg2: memref<1x2048xf32, #tpu.memory_space<vmem>>, %arg3: memref<1x2048xf32, #tpu.memory_space<vmem>>, %arg4: memref<1x2048xf32, #tpu.memory_space<vmem>>) attributes {dimension_semantics = [#tpu.dimension_semantics<parallel>, #tpu.dimension_semantics<parallel>], iteration_bounds = array<i64: 1, 1>, scalar_prefetch = 0 : i64, scratch_operands = 0 : i64, tpu.core_type = #tpu.core_type<tc>, window_params = [{transform_indices = @transform_0, window_bounds = array<i64: 1, 2048>}, {transform_indices = @transform_1, window_bounds = array<i64: 1, 2048>}, {transform_indices = @transform_2, window_bounds = array<i64: 1, 2048>}]} {
    %c0 = arith.constant 0 : index
    %c0_0 = arith.constant 0 : index
    %0 = vector.load %arg2[%c0, %c0_0] : memref<1x2048xf32, #tpu.memory_space<vmem>>, vector<1x2048xf32>
    %c0_1 = arith.constant 0 : index
    %c0_2 = arith.constant 0 : index
    %1 = vector.load %arg3[%c0_1, %c0_2] : memref<1x2048xf32, #tpu.memory_space<vmem>>, vector<1x2048xf32>
    %2 = arith.mulf %0, %1 : vector<1x2048xf32>
    %c0_3 = arith.constant 0 : index
    %c0_4 = arith.constant 0 : index
    %3 = vector.load %arg4[%c0_3, %c0_4] : memref<1x2048xf32, #tpu.memory_space<vmem>>, vector<1x2048xf32>
    tpu.vector_store %arg4[%c0_3, %c0_4], %2 {strides = array<i32>} : memref<1x2048xf32, #tpu.memory_space<vmem>>, vector<1x2048xf32>,
    return
  }
  func.func @transform_0(%arg0: i32, %arg1: i32) -> (i32, i32) {
    %c0_i32 = arith.constant 0 : i32
    return %arg1, %arg0 : i32, i32
  }
  func.func @transform_1(%arg0: i32, %arg1: i32) -> (i32, i32) {
    %c0_i32 = arith.constant 0 : i32
    %c0_i32_0 = arith.constant 0 : i32
    return %c0_i32, %arg0 : i32, i32
  }
  func.func @transform_2(%arg0: i32, %arg1: i32) -> (i32, i32) {
    %c0_i32 = arith.constant 0 : i32
    return %arg1, %arg0 : i32, i32
  }
}

</mosaic_0001>

<bundles_post_ra>
// kernel: tpu_custom_call.1
= control target key start
LH: loop header
LB: loop body
LE: loop exit
PB: predicated region body
PF: predicated region fallthrough
CT: control target
= control target key end

     0   :  { %7 = vsyncpa [#allocation3], 0  ;;  %s174_s0 = inlined_call_operand.hbm [shape: f32[1,2048], index: 0, kind: input, shape index: {}]   ;;  %s175_s1 = inlined_call_operand.hbm [shape: f32[1,2048], index: 1, kind: input, shape index: {}]   ;;  %s176_s2 = inlined_call_operand.hbm [shape: f32[1,2048], index: 2, kind: output, shape index: {}]  }
   0x1   :  { %8 = vsyncpa [#allocation6], 0 }
   0x2   :  { %9 = vsyncpa [#allocation4], 0  ;;  %s15_s11 = sshll.u32 %s174_s0, 4  ;;  %s147_s12 = smov [#allocation2]   ;;  %s16_s11 = int_to_ptr.hbm [resolvable:$true] %s15_s11 }
   0x3   :  { %s17_s13 = sshll.u32 %s147_s12, 4  ;;  %s26_s16 = sshll.u32 %s175_s1, 4  ;;  %s18_s13 = int_to_ptr.vmem [resolvable:$true] %s17_s13  ;;  %s27_s16 = int_to_ptr.hbm [resolvable:$true] %s26_s16 }
   0x4   :  { %20 = dma.hbm_to_vmem [thread:$0]  %s16_s11, 256, %s18_s13, [#allocation3]  }
   0x5   :  { %s148_s17 = smov [#allocation5]  }
   0x6   :  { %s28_s18 = sshll.u32 %s148_s17, 4  ;;  %s29_s18 = int_to_ptr.vmem [resolvable:$true] %s28_s18 }
   0x7   :  { %31 = dma.hbm_to_vmem [thread:$0]  %s27_s16, 256, %s29_s18, [#allocation6]  }
   0x8   :  { %141 = dma.done.wait [#allocation3], 256  }
   0x9   :  { %142 = vsyncadd [#allocation3], 4294967040 }
   0xa   :  { %143 = dma.done.wait [#allocation6], 256  }
   0xb   :  { %144 = vsyncadd [#allocation6], 4294967040  ;;  %s149_s19 = smov [#allocation7]   ;;  %s55_s22 = sshll.u32 %s176_s2, 4  ;;  %v40_v0 = vld [vmem:[#allocation2] sm:$0xff]  ;;  %v42_v1 = vld [vmem:[#allocation5] sm:$0xff]  ;;  %s56_s22 = int_to_ptr.hbm [resolvable:$true] %s55_s22 }
   0xc   :  { %s53_s0 = sshll.u32 %s149_s19, 4  ;;  %v41_v2 = vld [vmem:[#allocation2 + $0x8] sm:$0xff]  ;;  %v44_v3 = vmul.f32 %v42_v1, %v40_v0  ;;  %v43_v4 = vld [vmem:[#allocation5 + $0x8] sm:$0xff]  ;;  %s54_s0 = int_to_ptr.vmem [resolvable:$true] %s53_s0 }
   0xd   :  { %v45_v5 = vmul.f32 %v43_v4, %v41_v2 }
   0xe   :  { %46 = vst [vmem:[#allocation7] sm:$0xff] %v44_v3 }
   0xf   :  { %47 = vst [vmem:[#allocation7 + $0x8] sm:$0xff] %v45_v5 }
  0x10   :  { %58 = dma.vmem_to_hbm [thread:$0]  %s54_s0, 256, %s56_s22, [#allocation4]  }
  0x11   :  { %145 = dma.done.wait [#allocation4], 256  }
  0x12   :  { %146 = vsyncadd [#allocation4], 4294967040 }
  0x13   :  { %63 = vsyncpa [#allocation3], 1 }
  0x14   :  { %64 = vsyncpa [#allocation6], 1 }
  0x15   :  { %65 = vsyncpa [#allocation4], 1 }

</bundles_post_ra>
